<compile_context>
chip_gen: v7x
topology: tpu7x:2x2x1
jax: 0.10.0
libtpu: 0.0.40
codegen_flags: <defaults>
</compile_context>

<pallas_src>
import functools

import jax
import jax.numpy as jnp
from jax.experimental import pallas as pl
from jax.experimental.pallas import tpu as pltpu


NEG_BIG = -1e30   # finite "-inf": keeps the online softmax NaN-free when a
                  # tile contains only masked keys.  (A row with *no* valid
                  # key anywhere is NaN in the PyTorch reference; callers are
                  # expected to avoid that state.)


def _pick_tile(extent, target, multiple):
    """Largest tile <= target that divides `extent` and is a multiple of
    `multiple`; falls back to the full extent (block == array dim is legal)."""
    if extent <= target:
        return extent
    t = (target // multiple) * multiple
    while t >= multiple:
        if extent % t == 0:
            return t
        t -= multiple
    return extent


def _round_up(x, m):
    return -(-x // m) * m


def _vmem_cap_bytes():
    """~75% of physical VMEM; the 64 MiB fallback covers v7x (64 MiB/TC)."""
    phys = 64 * 2 ** 20
    try:
        info = pltpu.get_tpu_info()
        phys = int(getattr(info, "vmem_capacity_bytes", phys) or phys)
    except Exception:
        pass
    return (phys * 3) // 4


# ----------------------------------------------------------------------------
# Fused linear projections (torch.nn.Linear, bias=False):  y_i = x @ W_i.T
# Row-tiled over M, reduction-tiled over Din (f32 accumulator in VMEM), so the
# stacked weight never has to be fully VMEM-resident.
# ----------------------------------------------------------------------------
def _fused_proj_kernel(x_ref, w_ref, *refs, compute_dtype, n_out):
    out_refs = refs[:n_out]
    acc_ref = refs[n_out]
    kk = pl.program_id(1)

    @pl.when(kk == 0)
    def _init():
        acc_ref[...] = jnp.zeros(acc_ref.shape, acc_ref.dtype)

    acc_ref[...] += jnp.dot(x_ref[...].astype(compute_dtype), w_ref[...],
                            preferred_element_type=jnp.float32)

    @pl.when(kk == pl.num_programs(1) - 1)
    def _finalize():
        off = 0
        for o_ref in out_refs:
            d = o_ref.shape[-1]
            o_ref[...] = acc_ref[:, off:off + d].astype(o_ref.dtype)
            off += d


def fused_linear(x2d, weights, *, compute_dtype, out_dtype, tm_target=256):
    """Returns tuple(x2d @ w.T for w in weights) from a single pallas_call."""
    M, Din = x2d.shape
    douts = [int(w.shape[0]) for w in weights]
    Dtot = sum(douts)
    # Pre-transpose + pre-cast the stacked weight once on the host.
    w_t = jnp.concatenate([jnp.asarray(w) for w in weights], axis=0).T
    w_t = w_t.astype(compute_dtype)

    x_itm = jnp.dtype(x2d.dtype).itemsize
    w_itm = jnp.dtype(compute_dtype).itemsize
    o_itm = jnp.dtype(out_dtype).itemsize

    sub = 16 if x_itm == 2 else 8
    tm = M if M <= tm_target else (tm_target // sub) * sub
    # Keep one (tkk, Dtot) weight tile <= ~8 MiB so double-buffering fits VMEM.
    max_tk = max(128, ((8 * 2 ** 20) // max(1, Dtot * w_itm)) // 128 * 128)
    tkk = _pick_tile(Din, min(512, max_tk), 128)
    grid = (pl.cdiv(M, tm), max(1, Din // tkk))

    est = (2 * (tm * tkk * x_itm + tkk * Dtot * w_itm + tm * Dtot * o_itm)
           + tm * Dtot * 4 + (2 << 20))
    vmem_limit = int(min(_vmem_cap_bytes(), max(8 * 2 ** 20, est)))
    cost = pl.CostEstimate(
        flops=int(2 * M * Din * Dtot),
        transcendentals=0,
        bytes_accessed=int(M * Din * x_itm
                           + grid[0] * Din * Dtot * w_itm
                           + M * Dtot * o_itm))

    outs = pl.pallas_call(
        functools.partial(_fused_proj_kernel, compute_dtype=compute_dtype,
                          n_out=len(weights)),
        out_shape=tuple(jax.ShapeDtypeStruct((M, d), out_dtype) for d in douts),
        grid=grid,
        in_specs=[pl.BlockSpec((tm, tkk), lambda i, kk: (i, kk)),
                  pl.BlockSpec((tkk, Dtot), lambda i, kk: (kk, 0))],
        out_specs=tuple(pl.BlockSpec((tm, d), lambda i, kk: (i, 0))
                        for d in douts),
        scratch_shapes=[pltpu.VMEM((tm, Dtot), jnp.float32)],
        compiler_params=pltpu.CompilerParams(
            dimension_semantics=("parallel", "arbitrary"),
            vmem_limit_bytes=vmem_limit),
        cost_estimate=cost,
    )(x2d, w_t)
    return tuple(outs) if isinstance(outs, (tuple, list)) else (outs,)


# ----------------------------------------------------------------------------
# Flash-style scaled dot-product attention core.
#   grid = (batch, q-tiles, k-tiles); all heads handled inside the kernel.
# ----------------------------------------------------------------------------
def _attn_kernel(*refs, n_heads, head_dim, mask_future, query_offset,
                 compute_dtype, approx_recip, has_kbias):
    if has_kbias:
        q_ref, k_ref, v_ref, kbias_ref, o_ref, acc_ref, m_ref, l_ref = refs
    else:
        q_ref, k_ref, v_ref, o_ref, acc_ref, m_ref, l_ref = refs
        kbias_ref = None

    tq = q_ref.shape[0]
    tk = k_ref.shape[0]
    qi = pl.program_id(1)
    ki = pl.program_id(2)

    @pl.when(ki == 0)
    def _init():
        acc_ref[...] = jnp.zeros(acc_ref.shape, acc_ref.dtype)
        m_ref[...] = jnp.full(m_ref.shape, NEG_BIG, m_ref.dtype)
        l_ref[...] = jnp.zeros(l_ref.shape, l_ref.dtype)

    def update(with_causal):
        bias = kbias_ref[...] if has_kbias else None            # (1, tk) f32
        if with_causal:
            rows = (jax.lax.broadcasted_iota(jnp.int32, (tq, tk), 0)
                    + qi * tq + query_offset)
            cols = jax.lax.broadcasted_iota(jnp.int32, (tq, tk), 1) + ki * tk
            causal = jnp.where(cols > rows, NEG_BIG, 0.0)       # (tq, tk) f32
            bias = causal if bias is None else causal + bias

        qkt = (((1,), (1,)), ((), ()))                          # q @ k^T (MXU)
        for h in range(n_heads):                                # static unroll
            hs = slice(h * head_dim, (h + 1) * head_dim)
            qh = q_ref[:, hs].astype(compute_dtype)   # 1/sqrt(d) folded in Wq
            kh = k_ref[:, hs].astype(compute_dtype)
            s = jax.lax.dot_general(qh, kh, qkt,
                                    preferred_element_type=jnp.float32)
            if bias is not None:
                s = s + bias
            m_prev = m_ref[h]                                   # (tq, 1) f32
            m_new = jnp.maximum(m_prev, jnp.max(s, axis=-1, keepdims=True))
            alpha = jnp.exp(m_prev - m_new)                     # (tq, 1)
            p = jnp.exp(s - m_new)                              # (tq, tk) f32
            l_ref[h] = alpha * l_ref[h] + jnp.sum(p, axis=-1, keepdims=True)
            # head-major in-place updates: no lane concatenations per k-tile
            acc_ref[h] = alpha * acc_ref[h] + jnp.dot(
                p.astype(compute_dtype), v_ref[:, hs].astype(compute_dtype),
                preferred_element_type=jnp.float32)
            m_ref[h] = m_new

    if mask_future:
        q_first = qi * tq + query_offset
        q_last = q_first + (tq - 1)
        k_first = ki * tk
        k_last = k_first + (tk - 1)
        live = k_first <= q_last       # tile has >= 1 causally-visible key
        diag = k_last > q_first        # tile straddles the causal diagonal

        @pl.when(live & diag)
        def _():                       # diagonal tiles: build the iota mask
            update(True)

        @pl.when(live & jnp.logical_not(diag))
        def _():                       # interior tiles: no mask arithmetic
            update(False)
        # fully-masked tiles (k_first > q_last) are skipped entirely
    else:
        update(False)

    @pl.when(ki == pl.num_programs(2) - 1)
    def _finalize():
        cols = [acc_ref[h] * pl.reciprocal(l_ref[h], approx=approx_recip)
                for h in range(n_heads)]
        # one lane-dense (tq, D) store per q-tile
        o_ref[...] = jnp.concatenate(cols, axis=-1).astype(o_ref.dtype)


def _attention(qp, kp, vp, kbias, *, n_heads, head_dim, mask_future,
               query_offset, compute_dtype, out_dtype):
    N, Lq, D = qp.shape
    _, Lk, _ = kp.shape
    has_kbias = kbias is not None
    itm = jnp.dtype(qp.dtype).itemsize
    o_itm = jnp.dtype(out_dtype).itemsize
    sub = 16 if itm == 2 else 8        # bf16 packs 2 rows per sublane

    tq = _pick_tile(Lq, 512, sub)
    tk = _pick_tile(Lk, 512, 128)
    # v7x has 2 TensorCores: make sure the parallel grid axes cover both.
    if N == 1 and tq == Lq and Lq >= 2 * sub:
        tq = _pick_tile(Lq, max(sub, Lq // 2), sub)

    d_pad = _round_up(head_dim, 128)

    def est_bytes(tq_, tk_):
        blk = (tq_ * D * itm + 2 * tk_ * D * itm
               + (tk_ * 4 if has_kbias else 0) + tq_ * D * o_itm)
        scratch = n_heads * tq_ * (d_pad + 2 * 128) * 4
        return 2 * blk + scratch + (2 << 20)

    cap = _vmem_cap_bytes()
    # Shrink tiles until the double-buffered working set fits (v7x: 64 MiB/TC).
    while (est_bytes(tq, tk) > cap and tk >= 256
           and (tk // 2) % 128 == 0 and Lk % (tk // 2) == 0):
        tk //= 2
    while (est_bytes(tq, tk) > cap and tq >= 2 * sub
           and (tq // 2) % sub == 0 and Lq % (tq // 2) == 0):
        tq //= 2

    grid = (N, Lq // tq, Lk // tk)
    vmem_limit = int(min(cap, max(8 * 2 ** 20, est_bytes(tq, tk))))

    frac = 0.5 if mask_future else 1.0
    cost = pl.CostEstimate(
        flops=int(4 * N * n_heads * Lq * Lk * head_dim * frac),
        transcendentals=int(N * n_heads * Lq * Lk * frac),
        bytes_accessed=int((qp.size + kp.size + vp.size) * itm
                           + (kbias.size * 4 if has_kbias else 0)
                           + N * Lq * D * o_itm))

    kernel = functools.partial(
        _attn_kernel, n_heads=n_heads, head_dim=head_dim,
        mask_future=mask_future, query_offset=int(query_offset),
        compute_dtype=compute_dtype,
        approx_recip=(o_itm < 4),       # exact reciprocal for f32 outputs
        has_kbias=has_kbias)

    in_specs = [
        pl.BlockSpec((None, tq, D), lambda n, qi, ki: (n, qi, 0)),
        pl.BlockSpec((None, tk, D), lambda n, qi, ki: (n, ki, 0)),
        pl.BlockSpec((None, tk, D), lambda n, qi, ki: (n, ki, 0)),
    ]
    inputs = [qp, kp, vp]
    if has_kbias:
        in_specs.append(pl.BlockSpec((None, 1, tk), lambda n, qi, ki: (n, 0, ki)))
        inputs.append(kbias)

    return pl.pallas_call(
        kernel,
        out_shape=jax.ShapeDtypeStruct((N, Lq, D), out_dtype),
        grid=grid,
        in_specs=in_specs,
        out_specs=pl.BlockSpec((None, tq, D), lambda n, qi, ki: (n, qi, 0)),
        scratch_shapes=[pltpu.VMEM((n_heads, tq, head_dim), jnp.float32),
                        pltpu.VMEM((n_heads, tq, 1), jnp.float32),
                        pltpu.VMEM((n_heads, tq, 1), jnp.float32)],
        compiler_params=pltpu.CompilerParams(
            dimension_semantics=("parallel", "parallel", "arbitrary"),
            vmem_limit_bytes=vmem_limit),
        cost_estimate=cost,
    )(*inputs)


# ----------------------------------------------------------------------------
# Module-level forward:  mirrors ScaledDotProductAttention.forward
# ----------------------------------------------------------------------------
def scaled_dot_product_attention(query, key, Wq, Wk, Wv,
                                 n_heads, projection_dim, mask_future,
                                 query_mask=None, key_mask=None,
                                 query_offset=0,
                                 compute_dtype=jnp.bfloat16):
    """query: (N, Lq, D), key: (N, Lk, D), D = n_heads * projection_dim."""
    N, Lq, D = query.shape
    _, Lk, _ = key.shape
    H, d = n_heads, projection_dim
    assert D == H * d

    proj_dtype = jnp.dtype(compute_dtype)
    # Fold 1/sqrt(d) into the query projection weight on the host
    # (removes a per-k-tile, per-head multiply from the attention kernel).
    Wq_s = jnp.asarray(Wq, jnp.float32) * (1.0 / float(d) ** 0.5)

    if query is key:   # self-attention: one fused 3-wide matmul, one DMA of x
        qp, kp, vp = fused_linear(query.reshape(N * Lq, D), (Wq_s, Wk, Wv),
                                  compute_dtype=compute_dtype,
                                  out_dtype=proj_dtype)
    else:              # cross-attention: q alone, k/v fused over the key input
        (qp,) = fused_linear(query.reshape(N * Lq, D), (Wq_s,),
                             compute_dtype=compute_dtype, out_dtype=proj_dtype)
        kp, vp = fused_linear(key.reshape(N * Lk, D), (Wk, Wv),
                              compute_dtype=compute_dtype, out_dtype=proj_dtype)
    qp = qp.reshape(N, Lq, D)          # reshapes are metadata-only
    kp = kp.reshape(N, Lk, D)
    vp = vp.reshape(N, Lk, D)

    # key padding mask as an additive bias (only materialized when present)
    kbias = None
    if key_mask is not None:
        kbias = key_mask.astype(jnp.float32).reshape(N, 1, Lk) * NEG_BIG

    out = _attention(qp, kp, vp, kbias,
                     n_heads=H, head_dim=d, mask_future=mask_future,
                     query_offset=query_offset, compute_dtype=compute_dtype,
                     out_dtype=query.dtype)

    # query padding mask: zero rows after the kernel (fused by XLA; avoids a
    # lane-width-1 block input DMA'd on every q-tile).
    if query_mask is not None:
        out = jnp.where(query_mask.reshape(N, Lq, 1),
                        jnp.zeros((), out.dtype), out)
    return out


# ----------------------------------------------------------------------------
# Pure-JAX reference (mirrors the PyTorch forward) for correctness checks.
# ----------------------------------------------------------------------------
def reference(query, key, Wq, Wk, Wv, H, d, mask_future, query_mask, key_mask,
              query_offset=0):
    N, Lq, _ = query.shape
    Lk = key.shape[1]
    q = (query @ Wq.T).reshape(N, Lq, H, d).transpose(0, 2, 1, 3)
    k = (key @ Wk.T).reshape(N, Lk, H, d).transpose(0, 2, 1, 3)
    v = (key @ Wv.T).reshape(N, Lk, H, d).transpose(0, 2, 1, 3)
    s = jnp.einsum('nhqd,nhkd->nhqk', q, k) / (float(d) ** 0.5)
    if mask_future:
        fm = jnp.arange(Lk)[None, :] > (jnp.arange(Lq)[:, None] + query_offset)
        s = jnp.where(fm[None, None], -jnp.inf, s)
    if key_mask is not None:
        s = jnp.where(key_mask[:, None, None, :], -jnp.inf, s)
    p = jax.nn.softmax(s, axis=-1)
    a = jnp.einsum('nhqk,nhkd->nhqd', p, v)
    a = a.transpose(0, 2, 1, 3).reshape(N, Lq, H * d)
    if query_mask is not None:
        a = jnp.where(query_mask[:, :, None], 0.0, a)
    return a


if __name__ == "__main__":
    n_heads = 4
    projection_dim = 8
    dim = n_heads * projection_dim       # 32
    N, Lq, Lk = 2, 8, 8

    key0 = jax.random.PRNGKey(0)
    k_q, k_k, k_wq, k_wk, k_wv = jax.random.split(key0, 5)
    query = jax.random.normal(k_q, (N, Lq, dim), jnp.float32)
    key_in = jax.random.normal(k_k, (N, Lk, dim), jnp.float32)

    # torch.nn.Linear default init: U(-1/sqrt(in_features), 1/sqrt(in_features))
    bound = 1.0 / (dim ** 0.5)
    Wq = jax.random.uniform(k_wq, (dim, dim), jnp.float32, -bound, bound)
    Wk = jax.random.uniform(k_wk, (dim, dim), jnp.float32, -bound, bound)
    Wv = jax.random.uniform(k_wv, (dim, dim), jnp.float32, -bound, bound)

    # masks (True == masked); every causal row keeps >= 1 valid key
    key_mask = jnp.zeros((N, Lk), bool).at[:, Lk - 1].set(True)
    query_mask = jnp.zeros((N, Lq), bool).at[1, Lq - 1].set(True)

    # 1) cross-attention path, bf16 MXU operands (v6e/v7x perf path)
    out_bf16 = scaled_dot_product_attention(
        query, key_in, Wq, Wk, Wv, n_heads, projection_dim, True,
        query_mask=query_mask, key_mask=key_mask,
        compute_dtype=jnp.bfloat16)
    out_bf16 = jax.block_until_ready(out_bf16)
    ref1 = reference(query, key_in, Wq, Wk, Wv, n_heads, projection_dim,
                     True, query_mask, key_mask)
    assert out_bf16.shape == (N, Lq, dim)
    assert out_bf16.dtype == query.dtype
    assert bool(jnp.allclose(out_bf16, ref1, atol=2e-2, rtol=2e-2)), \
        "bf16 kernel mismatch vs reference"

    # 2) self-attention path (query is key -> single fused QKV matmul),
    #    all-f32 compute for a tight check of the online-softmax structure.
    out_f32 = scaled_dot_product_attention(
        query, query, Wq, Wk, Wv, n_heads, projection_dim, True,
        query_mask=query_mask, key_mask=key_mask,
        compute_dtype=jnp.float32)
    out_f32 = jax.block_until_ready(out_f32)
    ref2 = reference(query, query, Wq, Wk, Wv, n_heads, projection_dim,
                     True, query_mask, key_mask)
    assert bool(jnp.allclose(out_f32, ref2, atol=1e-4, rtol=1e-4)), \
        "f32 kernel mismatch vs reference"

    print("KERNEL_OK")
</pallas_src>

<mosaic_0001>
module attributes {stable_mosaic.version = 11 : i64} {
  func.func @_fused_proj_kernel(%arg0: i32, %arg1: i32, %arg2: memref<16x32xf32, #tpu.memory_space<vmem>>, %arg3: memref<32x32xbf16, #tpu.memory_space<vmem>>, %arg4: memref<16x32xbf16, #tpu.memory_space<vmem>>, %arg5: memref<16x32xf32, #tpu.memory_space<vmem>>) attributes {dimension_semantics = [#tpu.dimension_semantics<parallel>, #tpu.dimension_semantics<arbitrary>], iteration_bounds = array<i64: 1, 1>, scalar_prefetch = 0 : i64, scratch_operands = 1 : i64, tpu.core_type = #tpu.core_type<tc>, window_params = [{transform_indices = @transform_0, window_bounds = array<i64: 16, 32>}, {transform_indices = @transform_1, window_bounds = array<i64: 32, 32>}, {transform_indices = @transform_2, window_bounds = array<i64: 16, 32>}]} {
    %c0_i32 = arith.constant 0 : i32
    %0 = arith.cmpi eq, %arg1, %c0_i32 : i32
    %1 = arith.extui %0 : i1 to i32
    %c0_i32_0 = arith.constant 0 : i32
    %2 = arith.cmpi ne, %1, %c0_i32_0 : i32
    scf.if %2 {
      %cst_10 = arith.constant 0.000000e+00 : f32
      %13 = vector.broadcast %cst_10 : f32 to vector<16x32xf32>
      %c0_11 = arith.constant 0 : index
      %c0_12 = arith.constant 0 : index
      %14 = vector.load %arg5[%c0_11, %c0_12] : memref<16x32xf32, #tpu.memory_space<vmem>>, vector<16x32xf32>
      tpu.vector_store %arg5[%c0_11, %c0_12], %13 {strides = array<i32>} : memref<16x32xf32, #tpu.memory_space<vmem>>, vector<16x32xf32>,
    } else {
    }
    %c0 = arith.constant 0 : index
    %c0_1 = arith.constant 0 : index
    %3 = vector.load %arg5[%c0, %c0_1] : memref<16x32xf32, #tpu.memory_space<vmem>>, vector<16x32xf32>
    %c0_2 = arith.constant 0 : index
    %c0_3 = arith.constant 0 : index
    %4 = vector.load %arg2[%c0_2, %c0_3] : memref<16x32xf32, #tpu.memory_space<vmem>>, vector<16x32xf32>
    %5 = arith.truncf %4 : vector<16x32xf32> to vector<16x32xbf16>
    %c0_4 = arith.constant 0 : index
    %c0_5 = arith.constant 0 : index
    %6 = vector.load %arg3[%c0_4, %c0_5] : memref<32x32xbf16, #tpu.memory_space<vmem>>, vector<32x32xbf16>
    %cst = arith.constant dense<0.000000e+00> : vector<16x32xf32>
    %7 = tpu.matmul %5, %6, %cst {dimension_numbers = #tpu.dot_dimension_numbers<[1], [0], [0], [1], [0, 0, 1, 1], [], []>} : vector<16x32xbf16>, vector<32x32xbf16>, vector<16x32xf32> -> vector<16x32xf32>
    %8 = arith.addf %3, %7 : vector<16x32xf32>
    %c0_6 = arith.constant 0 : index
    %c0_7 = arith.constant 0 : index
    %9 = vector.load %arg5[%c0_6, %c0_7] : memref<16x32xf32, #tpu.memory_space<vmem>>, vector<16x32xf32>
    tpu.vector_store %arg5[%c0_6, %c0_7], %8 {strides = array<i32>} : memref<16x32xf32, #tpu.memory_space<vmem>>, vector<16x32xf32>,
    %c0_i32_8 = arith.constant 0 : i32
    %10 = arith.cmpi eq, %arg1, %c0_i32_8 : i32
    %11 = arith.extui %10 : i1 to i32
    %c0_i32_9 = arith.constant 0 : i32
    %12 = arith.cmpi ne, %11, %c0_i32_9 : i32
    scf.if %12 {
      %c0_10 = arith.constant 0 : index
      %c0_11 = arith.constant 0 : index
      %13 = vector.load %arg5[%c0_10, %c0_11] : memref<16x32xf32, #tpu.memory_space<vmem>>, vector<16x32xf32>
      %14 = arith.truncf %13 : vector<16x32xf32> to vector<16x32xbf16>
      %c0_12 = arith.constant 0 : index
      %c0_13 = arith.constant 0 : index
      %15 = vector.load %arg4[%c0_12, %c0_13] : memref<16x32xbf16, #tpu.memory_space<vmem>>, vector<16x32xbf16>
      tpu.vector_store %arg4[%c0_12, %c0_13], %14 {strides = array<i32>} : memref<16x32xbf16, #tpu.memory_space<vmem>>, vector<16x32xbf16>,
    } else {
    }
    return
  }
  func.func @transform_0(%arg0: i32, %arg1: i32) -> (i32, i32) {
    %c0_i32 = arith.constant 0 : i32
    return %arg0, %arg1 : i32, i32
  }
  func.func @transform_1(%arg0: i32, %arg1: i32) -> (i32, i32) {
    %c0_i32 = arith.constant 0 : i32
    %c0_i32_0 = arith.constant 0 : i32
    return %arg1, %c0_i32 : i32, i32
  }
  func.func @transform_2(%arg0: i32, %arg1: i32) -> (i32, i32) {
    %c0_i32 = arith.constant 0 : i32
    %c0_i32_0 = arith.constant 0 : i32
    return %arg0, %c0_i32 : i32, i32
  }
}

</mosaic_0001>

<bundles_post_ra>
// kernel: tpu_custom_call.1
= control target key start
LH: loop header
LB: loop body
LE: loop exit
PB: predicated region body
PF: predicated region fallthrough
CT: control target
= control target key end

     0   :  { %7 = vsyncpa [#allocation4], 0  ;;  %s324_s0 = inlined_call_operand.hbm [shape: f32[16,32], index: 0, kind: input, shape index: {}]   ;;  %s325_s1 = inlined_call_operand.hbm [shape: bf16[32,32], index: 1, kind: input, shape index: {}]   ;;  %s326_s2 = inlined_call_operand.hbm [shape: bf16[16,32], index: 2, kind: output, shape index: {}]  }
   0x1   :  { %8 = vsyncpa [#allocation7], 0 }
   0x2   :  { %9 = vsyncpa [#allocation5], 0  ;;  %s253_s9 = smov [#allocation3]   ;;  %s181_s13 = scalar_lea.hbm %s324_s0, 256 }
   0x3   :  { %s15_s10 = sshll.u32 %s253_s9, 4  ;;  %p182_p0 = scmp.ne.s32.totalorder %s324_s0, %s181_s13  ;;  %s16_s10 = int_to_ptr.vmem [resolvable:$true] %s15_s10 }
   0x4   :  { %p185_p1 = scmp.lt.u32.totalorder %s181_s13, %s324_s0 }
   0x6   :  { %p187_p2 = pnand %p185_p1, %p182_p0 }
   0x8   :  { %190 = shalt.err (!%p187_p2)
}
   0x9   :  { %s191_s18 = scalar_lea.vmem %s16_s10, 256  ;;  %p196_p4 = scmp.lt.s32.totalorder %s16_s10, %s16_s10 }
   0xa   :  { %p192_p3 = scmp.ne.s32.totalorder %s16_s10, %s191_s18  ;;  %p197_p5 = scmp.lt.s32.totalorder %s191_s18, %s191_s18 }
   0xc   :  { %p198_p6 = por %p197_p5, %p196_p4 }
   0xe   :  { %p199_p7 = pnand %p198_p6, %p192_p3 }
  0x10   :  { %202 = shalt.err (!%p199_p7)
}
  0x11   :  { %s254_s19 = smov 128   ;;  %s255_s20 = smov 8  }
  0x12   :  { %21 = dma.hbm_to_vmem [thread:$0]  %s324_s0, 256, %s16_s10, [#allocation4], %s254_s19, %s254_s19, %s255_s20  }
  0x13   :  { %s256_s23 = smov [#allocation6]   ;;  %s203_s27 = scalar_lea.hbm %s325_s1, 256 }
  0x14   :  { %s27_s24 = sshll.u32 %s256_s23, 4  ;;  %p204_p8 = scmp.ne.s32.totalorder %s325_s1, %s203_s27  ;;  %s28_s24 = int_to_ptr.vmem [resolvable:$true] %s27_s24 }
  0x15   :  { %p207_p9 = scmp.lt.u32.totalorder %s203_s27, %s325_s1 }
  0x17   :  { %p209_p10 = pnand %p207_p9, %p204_p8 }
  0x19   :  { %212 = shalt.err (!%p209_p10)
}
  0x1a   :  { %s213_s4 = scalar_lea.vmem %s28_s24, 256  ;;  %p218_p12 = scmp.lt.s32.totalorder %s28_s24, %s28_s24 }
  0x1b   :  { %p214_p11 = scmp.ne.s32.totalorder %s28_s24, %s213_s4  ;;  %p219_p13 = scmp.lt.s32.totalorder %s213_s4, %s213_s4 }
  0x1d   :  { %p220_p0 = por %p219_p13, %p218_p12 }
  0x1f   :  { %p221_p1 = pnand %p220_p0, %p214_p11 }
  0x21   :  { %224 = shalt.err (!%p221_p1)
}
  0x22   :  { %s257_s0 = smov 64   ;;  %s258_s5 = smov 4  }
  0x23   :  { %33 = dma.hbm_to_vmem [thread:$0]  %s325_s1, 256, %s28_s24, [#allocation7], %s257_s0, %s257_s0, %s258_s5  }
  0x24   :  { %247 = dma.done.wait [#allocation4], 256  }
  0x25   :  { %248 = vsyncadd [#allocation4], 4294967040 }
  0x26   :  { %249 = dma.done.wait [#allocation7], 256  }
  0x27   :  { %250 = vsyncadd [#allocation7], 4294967040  ;;  %vm45_vm0 = vcmask 261120   ;;  %v259_v0 = vmov 0.0   ;;  %vm260_vm1 = vmmov 0   ;;  %v179_v1 = vld [vmem:[#allocation6] sm:$0xff]  }
  0x28   :  { %162 = vmatprep.subr.bf16.mxu0 %v259_v0  ;;  %166 = vmatprep.mubr.msk.bf16.mxu0 %vm260_vm1, %v259_v0  ;;  %46 = vst.msk [vmem:[#allocation2] sm:$0xff] %vm45_vm0, %v259_v0  ;;  %47 = vst.msk [vmem:[#allocation2 + $0x8] sm:$0xff] %vm45_vm0, %v259_v0  ;;  %v180_v2 = vld [vmem:[#allocation6 + $0x8] sm:$0xff]   ;;  %v50_v3 = vld [vmem:[#allocation3] sm:$0xff]  ;;  %vm131_vm2 = vcmask 257024   ;;  %s261_s1 = smov [#allocation8]  }
  0x29   :  { %163 = vmatpush3.bf16.msra.mxu0 %v179_v1  ;;  %v51_v4 = vld [vmem:[#allocation3 + $0x8] sm:$0xff]  ;;  %s139_s8 = sshll.u32 %s261_s1, 4  ;;  %s140_s8 = int_to_ptr.vmem [resolvable:$true] %s139_s8 }
  0x2a   :  { %164 = vmatprep.subr.bf16.mxu0 %v259_v0  ;;  %v52_v5 = vpack.c.bf16 %v51_v4, %v50_v3  ;;  %s225_s9 = scalar_lea.vmem %s140_s8, 128  ;;  %p230_p3 = scmp.lt.s32.totalorder %s140_s8, %s140_s8 }
  0x2b   :  { %p226_p2 = scmp.ne.s32.totalorder %s140_s8, %s225_s9  ;;  %p231_p4 = scmp.lt.s32.totalorder %s225_s9, %s225_s9 }
  0x2d   :  { %165 = vmatpush3.bf16.msra.mxu0 %v180_v2  ;;  %p232_p5 = por %p231_p4, %p230_p3 }
  0x2f   :  { %v48_v6 = vld [vmem:[#allocation2] sm:$0xff]  ;;  %v49_v8 = vld [vmem:[#allocation2 + $0x8] sm:$0xff]  ;;  %p233_p6 = pnand %p232_p5, %p226_p2 }
  0x30   :  { %167 = vmatmul.mubr.msk.bf16.vlgmr.msra.gmra.mrb[0].mxu0 %vm45_vm0, %v52_v5 }
 0x103   :  { %v107_v7 = vpop.f32.mrb[0].mxu0 }
 0x104   :  { %v114_v9 = vadd.f32 %v107_v7, %v48_v6  ;;  %v168_v10 = vpop.f32.mrb[1].mxu0 }
 0x105   :  { %v110_v11 = vpop.f32.mrb[2].mxu0 }
 0x106   :  { %116 = vst.msk [vmem:[#allocation2] sm:$0xff] %vm45_vm0, %v114_v9  ;;  %v115_v12 = vadd.f32 %v110_v11, %v49_v8  ;;  %v169_v13 = vpop.f32.mrb[3].mxu0 }
 0x108   :  { %117 = vst.msk [vmem:[#allocation2 + $0x8] sm:$0xff] %vm45_vm0, %v115_v12 }
 0x10d   :  { %v121_v14 = vld [vmem:[#allocation2] sm:$0xff] }
 0x10e   :  { %v157_v15 = vpack.c.bf16 %v121_v14, %v121_v14 }
 0x10f   :  { %v122_v16 = vld [vmem:[#allocation2 + $0x8] sm:$0xff] }
 0x110   :  { %v158_v17 = vpack.c.bf16 %v122_v16, %v122_v16  ;;  %132 = vst.msk [vmem:[#allocation8] sm:$0xf] %vm131_vm2, %v157_v15 }
 0x112   :  { %133 = vst.msk [vmem:[#allocation8 + $0x4] sm:$0xf] %vm131_vm2, %v158_v17 }
 0x113   :  { %236 = shalt.err (!%p233_p6)
}
 0x114   :  { %s237_s12 = scalar_lea.hbm %s326_s2, 128 }
 0x115   :  { %p238_p7 = scmp.ne.s32.totalorder %s326_s2, %s237_s12  ;;  %p241_p8 = scmp.lt.u32.totalorder %s237_s12, %s326_s2 }
 0x117   :  { %p243_p9 = pnand %p241_p8, %p238_p7 }
 0x119   :  { %246 = shalt.err (!%p243_p9)
}
 0x11a   :  { %145 = dma.vmem_to_hbm [thread:$0]  %s140_s8, 128, %s326_s2, [#allocation5], %s257_s0, %s257_s0, %s258_s5  }
 0x11b   :  { %251 = dma.done.wait [#allocation5], 128  }
 0x11c   :  { %252 = vsyncadd [#allocation5], 4294967168 }
 0x11d   :  { %149 = vsyncpa [#allocation4], 1 }
 0x11e   :  { %150 = vsyncpa [#allocation7], 1 }
 0x11f   :  { %151 = vsyncpa [#allocation5], 1 }

</bundles_post_ra>
